<compile_context>
chip_gen: v7x
topology: tpu7x:2x2x1
jax: 0.10.0
libtpu: 0.0.40
codegen_flags: <defaults>
</compile_context>

<pallas_src>
import functools
import math

import jax
import jax.numpy as jnp
from jax.experimental import pallas as pl
from jax.experimental.pallas import tpu as pltpu


def _round_up(x, m):
    return ((x + m - 1) // m) * m


_NEG_INF = -1e30
_RESIDENT_KB_BUDGET = 12 << 20       # bytes of bf16 keys^T + values kept VMEM-resident
_RESIDENT_SCORES_BUDGET = 8 << 20    # bytes of the [ts, kp] f32 score matrix


# -----------------------------------------------------------------------------
# Kernels
# -----------------------------------------------------------------------------
def _kblam_resident_kernel(*refs, project, use_bias):
    """1-D grid over seq tiles; the whole (padded) KB is VMEM-resident."""
    it = iter(refs)
    x_ref = next(it)
    if project:
        wqt_ref = next(it)
        bq_ref = next(it)
    else:
        qin_ref = next(it)
    keyst_ref = next(it)
    vals_ref = next(it)
    bias_ref = next(it) if use_bias else None
    out_ref = next(it)

    if project:
        q = jnp.dot(x_ref[...].astype(wqt_ref.dtype), wqt_ref[...],
                    preferred_element_type=jnp.float32) + bq_ref[...]
        q = q.astype(keyst_ref.dtype)         # scale already folded into W_q / b_q
    else:
        q = qin_ref[...]

    s = jnp.dot(q, keyst_ref[...], preferred_element_type=jnp.float32)
    if use_bias:
        s = s + bias_ref[...]                 # padded KB columns -> -1e30

    m = jnp.max(s, axis=-1, keepdims=True)
    p = jnp.exp(s - m)
    l = jnp.sum(p, axis=-1, keepdims=True)
    ctx = jnp.dot(p.astype(vals_ref.dtype), vals_ref[...],
                  preferred_element_type=jnp.float32)
    inv_l = pl.reciprocal(l, approx=True)
    out_ref[...] = (x_ref[...].astype(jnp.float32) + ctx * inv_l).astype(out_ref.dtype)


def _kblam_stream_kernel(*refs, project, use_bias):
    """2-D grid (seq tiles "parallel", KB tiles "arbitrary"); online softmax."""
    it = iter(refs)
    x_ref = next(it)
    if project:
        wqt_ref = next(it)
        bq_ref = next(it)
    else:
        qin_ref = next(it)
    keyst_ref = next(it)
    vals_ref = next(it)
    bias_ref = next(it) if use_bias else None
    out_ref = next(it)
    q_ref = next(it) if project else None
    m_ref = next(it)
    l_ref = next(it)
    acc_ref = next(it)

    k = pl.program_id(1)

    # init (first KB tile for this seq tile): project queries once, zero stats.
    @pl.when(k == 0)
    def _():
        if project:
            q = jnp.dot(x_ref[...].astype(wqt_ref.dtype), wqt_ref[...],
                        preferred_element_type=jnp.float32) + bq_ref[...]
            q_ref[...] = q.astype(q_ref.dtype)
        m_ref[...] = jnp.full_like(m_ref, -jnp.inf)
        l_ref[...] = jnp.zeros_like(l_ref)
        acc_ref[...] = jnp.zeros_like(acc_ref)

    q = q_ref[...] if project else qin_ref[...]
    s = jnp.dot(q, keyst_ref[...], preferred_element_type=jnp.float32)
    if use_bias:
        s = s + bias_ref[...]                 # single broadcast add, no iota/select

    # online softmax update
    m_prev = m_ref[...]
    m_new = jnp.maximum(m_prev, jnp.max(s, axis=-1, keepdims=True))
    alpha = jnp.exp(m_prev - m_new)
    p = jnp.exp(s - m_new)
    l_ref[...] = alpha * l_ref[...] + jnp.sum(p, axis=-1, keepdims=True)
    acc_ref[...] = alpha * acc_ref[...] + jnp.dot(
        p.astype(vals_ref.dtype), vals_ref[...], preferred_element_type=jnp.float32)
    m_ref[...] = m_new

    # finalize (last KB tile): normalize + residual add, lane-dense store.
    @pl.when(k == pl.num_programs(1) - 1)
    def _():
        inv_l = pl.reciprocal(l_ref[...], approx=True)
        out_ref[...] = (x_ref[...].astype(jnp.float32)
                        + acc_ref[...] * inv_l).astype(out_ref.dtype)


# -----------------------------------------------------------------------------
# One-time parameter preparation (hoisted out of the per-call path)
# -----------------------------------------------------------------------------
def prepare_kblam_params(kb_keys, kb_values, wq, bq, *, kb_scale_factor=100.0,
                         compute_dtype=jnp.bfloat16, kb_tile=1024):
    """Pad / transpose / cast the KB and projection parameters once.

    kb_keys, kb_values: [num_kb, hidden] (stacked dict values)
    wq: [hidden, hidden] (PyTorch Linear weight, out x in), bq: [hidden]
    """
    num_kb, hidden = kb_keys.shape
    # log(kb_scale_factor) - log(num_kb) is a constant per-row shift -> exact
    # softmax no-op -> dropped as dead compute.
    del kb_scale_factor
    scale = 1.0 / math.sqrt(hidden)

    hp = _round_up(hidden, 128)
    if hp > 128:
        hp = _round_up(hidden, 256)           # v6e/v7x MXU is 2x256x256
    tkb = kb_tile if num_kb >= kb_tile else _round_up(num_kb, 128)
    kp = _round_up(num_kb, tkb)

    # fold 1/sqrt(hidden) into the projection; pre-transpose W so kernel does x @ Wt
    wqt = jnp.zeros((hp, hp), compute_dtype).at[:hidden, :hidden].set(
        (wq.T * scale).astype(compute_dtype))
    bqp = jnp.zeros((1, hp), jnp.float32).at[0, :hidden].set(
        bq.astype(jnp.float32) * scale)
    keyst = jnp.zeros((hp, kp), compute_dtype).at[:hidden, :num_kb].set(
        kb_keys.T.astype(compute_dtype))
    vals = jnp.zeros((kp, hp), compute_dtype).at[:num_kb, :hidden].set(
        kb_values.astype(compute_dtype))

    use_bias = (kp != num_kb)
    bias = None
    if use_bias:
        # Note: pad < tkb always, so a KB tile can never be fully masked.
        col = jnp.arange(kp)
        bias = jnp.where(col < num_kb, 0.0, _NEG_INF).astype(jnp.float32).reshape(1, kp)

    return dict(wqt=wqt, bq=bqp, keyst=keyst, vals=vals, bias=bias,
                hidden=int(hidden), num_kb=int(num_kb), hp=int(hp), kp=int(kp),
                tkb=int(tkb), compute_dtype=compute_dtype)


# -----------------------------------------------------------------------------
# Forward
# -----------------------------------------------------------------------------
def kblam_apply(params, llm_hidden_states, *, seq_tile=512,
                project_outside=None, force_stream=False, interpret=False):
    seq, hidden = llm_hidden_states.shape
    assert hidden == params["hidden"]
    num_kb = params["num_kb"]
    if num_kb == 0:
        return llm_hidden_states

    cd = params["compute_dtype"]
    hp, kp, tkb = params["hp"], params["kp"], params["tkb"]
    use_bias = params["bias"] is not None
    out_dtype = llm_hidden_states.dtype
    x_dtype = llm_hidden_states.dtype
    cd_size = jnp.dtype(cd).itemsize
    x_size = jnp.dtype(x_dtype).itemsize
    out_size = jnp.dtype(out_dtype).itemsize

    # Seq tile: big default so the streamed-KB arithmetic intensity (= ts flops/byte)
    # clears the HBM roofline.  (On v7x, prefer a seq length giving >=2 seq tiles so
    # both TensorCores are active.)
    ts = seq_tile if seq >= seq_tile else _round_up(seq, 8)
    sp = _round_up(seq, ts)
    n_seq_tiles = sp // ts

    if project_outside is None:
        project_outside = hidden >= 2048      # keep a huge W_q^T out of VMEM (v7x)
    project = not project_outside

    x_p = jnp.zeros((sp, hp), x_dtype).at[:seq, :hidden].set(llm_hidden_states)

    q_p = None
    if project_outside:
        # Plain XLA matmul feeding q into the kernel; frees VMEM for larger tiles.
        q_p = (jnp.dot(x_p.astype(cd), params["wqt"],
                       preferred_element_type=jnp.float32)
               + params["bq"]).astype(cd)

    kb_resident_bytes = (params["keyst"].size + params["vals"].size) * cd_size
    resident = ((not force_stream)
                and kb_resident_bytes <= _RESIDENT_KB_BUDGET
                and ts * kp * 4 <= _RESIDENT_SCORES_BUDGET)

    if resident:
        # ----- resident-KB fast path: KB read from HBM exactly once -------------
        grid = (n_seq_tiles,)
        kernel = functools.partial(_kblam_resident_kernel,
                                   project=project, use_bias=use_bias)
        in_specs = [pl.BlockSpec((ts, hp), lambda i: (i, 0))]
        operands = [x_p]
        if project:
            in_specs += [
                pl.BlockSpec((hp, hp), lambda i: (0, 0), pipeline_mode=pl.Buffered(1)),
                pl.BlockSpec((1, hp), lambda i: (0, 0), pipeline_mode=pl.Buffered(1)),
            ]
            operands += [params["wqt"], params["bq"]]
        else:
            in_specs += [pl.BlockSpec((ts, hp), lambda i: (i, 0))]
            operands += [q_p]
        in_specs += [
            pl.BlockSpec((hp, kp), lambda i: (0, 0), pipeline_mode=pl.Buffered(1)),
            pl.BlockSpec((kp, hp), lambda i: (0, 0), pipeline_mode=pl.Buffered(1)),
        ]
        operands += [params["keyst"], params["vals"]]
        if use_bias:
            in_specs += [pl.BlockSpec((1, kp), lambda i: (0, 0),
                                      pipeline_mode=pl.Buffered(1))]
            operands += [params["bias"]]
        out_specs = pl.BlockSpec((ts, hp), lambda i: (i, 0))
        scratch_shapes = []
        dim_sem = ("parallel",)
        kb_stream_factor = 1
        need = (2 * ts * hp * x_size                          # x (double-buffered)
                + 2 * ts * hp * out_size                      # out
                + ((hp * hp * cd_size + hp * 4) if project else 2 * ts * hp * cd_size)
                + (hp * kp + kp * hp) * cd_size               # resident KB (single)
                + (kp * 4 if use_bias else 0)
                + 2 * ts * kp * 4                             # s, p temporaries
                + 2 * ts * hp * 4)                            # q / ctx temporaries
    else:
        # ----- streamed flash path ----------------------------------------------
        grid = (n_seq_tiles, kp // tkb)
        kernel = functools.partial(_kblam_stream_kernel,
                                   project=project, use_bias=use_bias)
        in_specs = [pl.BlockSpec((ts, hp), lambda i, k: (i, 0))]
        operands = [x_p]
        if project:
            in_specs += [
                pl.BlockSpec((hp, hp), lambda i, k: (0, 0),
                             pipeline_mode=pl.Buffered(1)),
                pl.BlockSpec((1, hp), lambda i, k: (0, 0),
                             pipeline_mode=pl.Buffered(1)),
            ]
            operands += [params["wqt"], params["bq"]]
        else:
            in_specs += [pl.BlockSpec((ts, hp), lambda i, k: (i, 0))]
            operands += [q_p]
        in_specs += [
            pl.BlockSpec((hp, tkb), lambda i, k: (0, k)),     # keys^T KB tile
            pl.BlockSpec((tkb, hp), lambda i, k: (k, 0)),     # values KB tile
        ]
        operands += [params["keyst"], params["vals"]]
        if use_bias:
            in_specs += [pl.BlockSpec((1, tkb), lambda i, k: (0, k))]
            operands += [params["bias"]]
        out_specs = pl.BlockSpec((ts, hp), lambda i, k: (i, 0))
        scratch_shapes = []
        if project:
            scratch_shapes.append(pltpu.VMEM((ts, hp), cd))   # projected queries
        scratch_shapes += [pltpu.VMEM((ts, 1), jnp.float32),  # running max
                           pltpu.VMEM((ts, 1), jnp.float32),  # running sum
                           pltpu.VMEM((ts, hp), jnp.float32)] # ctx accumulator
        dim_sem = ("parallel", "arbitrary")
        kb_stream_factor = n_seq_tiles
        need = (2 * ts * hp * x_size
                + 2 * ts * hp * out_size
                + ((hp * hp * cd_size + hp * 4) if project else 2 * ts * hp * cd_size)
                + 2 * (hp * tkb + tkb * hp) * cd_size         # streamed KB (double)
                + (2 * tkb * 4 if use_bias else 0)
                + (ts * hp * cd_size if project else 0)       # q scratch
                + 2 * ts * 4 + ts * hp * 4                    # m, l, acc scratch
                + 2 * ts * tkb * 4)                           # s, p temporaries

    # Explicit scoped-VMEM limit sized from the actual buffer sum (+ headroom),
    # capped at the chip's physical VMEM.
    try:
        cap = int(pltpu.get_tpu_info().vmem_capacity_bytes) * 7 // 8
    except Exception:  # pragma: no cover - conservative fallback (v7x per-TC VMEM)
        cap = 56 << 20
    vmem_limit = int(min(max(int(need * 1.25) + (2 << 20), 32 << 20), cap))

    flops = (2 * seq * hidden * hidden if project else 0) + 4 * seq * num_kb * hidden
    bytes_accessed = int(
        x_p.size * x_size + sp * hp * out_size
        + ((params["wqt"].size * cd_size + params["bq"].size * 4)
           if project else q_p.size * cd_size)
        + kb_stream_factor * ((params["keyst"].size + params["vals"].size) * cd_size
                              + (params["bias"].size * 4 if use_bias else 0)))

    out = pl.pallas_call(
        kernel,
        out_shape=jax.ShapeDtypeStruct((sp, hp), out_dtype),
        grid_spec=pltpu.PrefetchScalarGridSpec(
            num_scalar_prefetch=0,
            grid=grid,
            in_specs=in_specs,
            out_specs=out_specs,
            scratch_shapes=scratch_shapes),
        compiler_params=pltpu.CompilerParams(
            dimension_semantics=dim_sem,
            vmem_limit_bytes=vmem_limit),
        cost_estimate=pl.CostEstimate(
            flops=flops, transcendentals=seq * num_kb,
            bytes_accessed=bytes_accessed),
        interpret=interpret,
    )(*operands)

    if sp == seq and hp == hidden:
        return out
    return out[:seq, :hidden]


def knowledge_integration_forward(llm_hidden_states, kb_keys, kb_values, wq, bq,
                                  kb_scale_factor=100.0,
                                  compute_dtype=jnp.bfloat16,
                                  seq_tile=512, kb_tile=1024,
                                  project_outside=None, force_stream=False):
    """Convenience one-shot wrapper (prepare + apply).

    For repeated calls with the same KB / weights, call prepare_kblam_params()
    once and reuse the result with kblam_apply() — the padding / transpose /
    cast work is fully amortizable.
    """
    if kb_keys.shape[0] == 0:
        return llm_hidden_states
    params = prepare_kblam_params(kb_keys, kb_values, wq, bq,
                                  kb_scale_factor=kb_scale_factor,
                                  compute_dtype=compute_dtype, kb_tile=kb_tile)
    return kblam_apply(params, llm_hidden_states, seq_tile=seq_tile,
                       project_outside=project_outside, force_stream=force_stream)


# -----------------------------------------------------------------------------
# Reference + test
# -----------------------------------------------------------------------------
def _reference_forward(x, kb_keys, kb_values, wq, bq, kb_scale_factor=100.0):
    # Pure-JAX f32 reference mirroring the PyTorch module.
    hidden = x.shape[1]
    num_kb = kb_keys.shape[0]
    q = x @ wq.T + bq
    scores = (q @ kb_keys.T) / math.sqrt(hidden)
    scores = scores + (math.log(kb_scale_factor) - math.log(max(num_kb, 1)))
    w = jax.nn.softmax(scores, axis=-1)
    return x + w @ kb_values


if __name__ == "__main__":
    def run_case(seq_len, hidden, num_kb, **kwargs):
        key = jax.random.PRNGKey(0)
        k_x, k_keys, k_vals, k_w, k_b = jax.random.split(key, 5)

        # "Module parameters" (nn.Linear-shaped: W [hidden, hidden], b [hidden]).
        bound = 1.0 / math.sqrt(hidden)
        wq = jax.random.uniform(k_w, (hidden, hidden), jnp.float32, -bound, bound)
        bq = jax.random.uniform(k_b, (hidden,), jnp.float32, -bound, bound)

        # Inputs: llm hidden states and stacked KB (key, value) token pairs.
        x = jax.random.normal(k_x, (seq_len, hidden), jnp.float32)
        kb_keys = jax.random.normal(k_keys, (num_kb, hidden), jnp.float32)
        kb_values = jax.random.normal(k_vals, (num_kb, hidden), jnp.float32)

        out = knowledge_integration_forward(x, kb_keys, kb_values, wq, bq, **kwargs)
        out = jax.block_until_ready(out)

        ref = _reference_forward(x, kb_keys, kb_values, wq, bq)
        assert out.shape == (seq_len, hidden)
        assert out.dtype == x.dtype
        # bf16 matmul inputs with f32 accumulation -> loosened tolerance vs f32 ref.
        assert jnp.allclose(out, ref, atol=5e-2, rtol=5e-2), (
            seq_len, hidden, num_kb, float(jnp.max(jnp.abs(out - ref))))

    # 1) Small case from the module spec: resident-KB fast path, in-kernel projection.
    run_case(8, 32, 16)
    # 2) Streamed flash path (multiple seq tiles x multiple KB tiles) with the
    #    additive padding-bias mask and online softmax.
    run_case(40, 64, 300, seq_tile=16, kb_tile=128, force_stream=True)
    # 3) Projection hoisted out of the kernel (the large-hidden / v7x configuration),
    #    exercised here at small shapes by forcing the flag.
    run_case(40, 64, 300, seq_tile=16, kb_tile=128, force_stream=True,
             project_outside=True)

    print("KERNEL_OK")
</pallas_src>

<mosaic_0001>
module attributes {stable_mosaic.version = 11 : i64} {
  func.func @_kblam_resident_kernel(%arg0: i32, %arg1: memref<8x128xf32, #tpu.memory_space<vmem>>, %arg2: memref<128x128xbf16, #tpu.memory_space<vmem>>, %arg3: memref<1x128xf32, #tpu.memory_space<vmem>>, %arg4: memref<128x128xbf16, #tpu.memory_space<vmem>>, %arg5: memref<128x128xbf16, #tpu.memory_space<vmem>>, %arg6: memref<1x128xf32, #tpu.memory_space<vmem>>, %arg7: memref<8x128xf32, #tpu.memory_space<vmem>>) attributes {dimension_semantics = [#tpu.dimension_semantics<parallel>], iteration_bounds = array<i64: 1>, scalar_prefetch = 0 : i64, scratch_operands = 0 : i64, tpu.core_type = #tpu.core_type<tc>, window_params = [{transform_indices = @transform_0, window_bounds = array<i64: 8, 128>}, {pipeline_mode = #tpu.pipeline_mode<synchronous>, transform_indices = @transform_1, window_bounds = array<i64: 128, 128>}, {pipeline_mode = #tpu.pipeline_mode<synchronous>, transform_indices = @transform_2, window_bounds = array<i64: 1, 128>}, {pipeline_mode = #tpu.pipeline_mode<synchronous>, transform_indices = @transform_3, window_bounds = array<i64: 128, 128>}, {pipeline_mode = #tpu.pipeline_mode<synchronous>, transform_indices = @transform_4, window_bounds = array<i64: 128, 128>}, {pipeline_mode = #tpu.pipeline_mode<synchronous>, transform_indices = @transform_5, window_bounds = array<i64: 1, 128>}, {transform_indices = @transform_6, window_bounds = array<i64: 8, 128>}]} {
    %c0 = arith.constant 0 : index
    %c0_0 = arith.constant 0 : index
    %0 = vector.load %arg1[%c0, %c0_0] : memref<8x128xf32, #tpu.memory_space<vmem>>, vector<8x128xf32>
    %1 = arith.truncf %0 : vector<8x128xf32> to vector<8x128xbf16>
    %c0_1 = arith.constant 0 : index
    %c0_2 = arith.constant 0 : index
    %2 = vector.load %arg2[%c0_1, %c0_2] : memref<128x128xbf16, #tpu.memory_space<vmem>>, vector<128x128xbf16>
    %cst = arith.constant dense<0.000000e+00> : vector<8x128xf32>
    %3 = tpu.matmul %1, %2, %cst {dimension_numbers = #tpu.dot_dimension_numbers<[1], [0], [0], [1], [0, 0, 1, 1], [], []>} : vector<8x128xbf16>, vector<128x128xbf16>, vector<8x128xf32> -> vector<8x128xf32>
    %c0_3 = arith.constant 0 : index
    %c0_4 = arith.constant 0 : index
    %4 = vector.load %arg3[%c0_3, %c0_4] : memref<1x128xf32, #tpu.memory_space<vmem>>, vector<1x128xf32>
    %5 = vector.broadcast %4 : vector<1x128xf32> to vector<8x128xf32>
    %6 = arith.addf %3, %5 : vector<8x128xf32>
    %7 = arith.truncf %6 : vector<8x128xf32> to vector<8x128xbf16>
    %c0_5 = arith.constant 0 : index
    %c0_6 = arith.constant 0 : index
    %8 = vector.load %arg4[%c0_5, %c0_6] : memref<128x128xbf16, #tpu.memory_space<vmem>>, vector<128x128xbf16>
    %cst_7 = arith.constant dense<0.000000e+00> : vector<8x128xf32>
    %9 = tpu.matmul %7, %8, %cst_7 {dimension_numbers = #tpu.dot_dimension_numbers<[1], [0], [0], [1], [0, 0, 1, 1], [], []>} : vector<8x128xbf16>, vector<128x128xbf16>, vector<8x128xf32> -> vector<8x128xf32>
    %c0_8 = arith.constant 0 : index
    %c0_9 = arith.constant 0 : index
    %10 = vector.load %arg6[%c0_8, %c0_9] : memref<1x128xf32, #tpu.memory_space<vmem>>, vector<1x128xf32>
    %11 = vector.broadcast %10 : vector<1x128xf32> to vector<8x128xf32>
    %12 = arith.addf %9, %11 : vector<8x128xf32>
    %cst_10 = arith.constant dense<0xFF800000> : vector<8xf32>
    %13 = vector.multi_reduction <maximumf>, %12, %cst_10 [1] : vector<8x128xf32> to vector<8xf32>
    %14 = vector.shape_cast %13 : vector<8xf32> to vector<8x1xf32>
    %15 = vector.broadcast %14 : vector<8x1xf32> to vector<8x128xf32>
    %16 = arith.subf %12, %15 : vector<8x128xf32>
    %17 = math.exp %16 : vector<8x128xf32>
    %cst_11 = arith.constant dense<0.000000e+00> : vector<8xf32>
    %18 = vector.multi_reduction <add>, %17, %cst_11 [1] : vector<8x128xf32> to vector<8xf32>
    %19 = vector.shape_cast %18 : vector<8xf32> to vector<8x1xf32>
    %20 = arith.truncf %17 : vector<8x128xf32> to vector<8x128xbf16>
    %c0_12 = arith.constant 0 : index
    %c0_13 = arith.constant 0 : index
    %21 = vector.load %arg5[%c0_12, %c0_13] : memref<128x128xbf16, #tpu.memory_space<vmem>>, vector<128x128xbf16>
    %cst_14 = arith.constant dense<0.000000e+00> : vector<8x128xf32>
    %22 = tpu.matmul %20, %21, %cst_14 {dimension_numbers = #tpu.dot_dimension_numbers<[1], [0], [0], [1], [0, 0, 1, 1], [], []>} : vector<8x128xbf16>, vector<128x128xbf16>, vector<8x128xf32> -> vector<8x128xf32>
    %23 = tpu.reciprocal %19 {approx = true} : vector<8x1xf32> -> vector<8x1xf32>
    %c0_15 = arith.constant 0 : index
    %c0_16 = arith.constant 0 : index
    %24 = vector.load %arg1[%c0_15, %c0_16] : memref<8x128xf32, #tpu.memory_space<vmem>>, vector<8x128xf32>
    %25 = vector.broadcast %23 : vector<8x1xf32> to vector<8x128xf32>
    %26 = arith.mulf %22, %25 : vector<8x128xf32>
    %27 = arith.addf %24, %26 : vector<8x128xf32>
    %c0_17 = arith.constant 0 : index
    %c0_18 = arith.constant 0 : index
    %28 = vector.load %arg7[%c0_17, %c0_18] : memref<8x128xf32, #tpu.memory_space<vmem>>, vector<8x128xf32>
    tpu.vector_store %arg7[%c0_17, %c0_18], %27 {strides = array<i32>} : memref<8x128xf32, #tpu.memory_space<vmem>>, vector<8x128xf32>,
    return
  }
  func.func @transform_0(%arg0: i32) -> (i32, i32) {
    %c0_i32 = arith.constant 0 : i32
    %c0_i32_0 = arith.constant 0 : i32
    return %arg0, %c0_i32 : i32, i32
  }
  func.func @transform_1(%arg0: i32) -> (i32, i32) {
    %c0_i32 = arith.constant 0 : i32
    %c0_i32_0 = arith.constant 0 : i32
    %c0_i32_1 = arith.constant 0 : i32
    return %c0_i32, %c0_i32_0 : i32, i32
  }
  func.func @transform_2(%arg0: i32) -> (i32, i32) {
    %c0_i32 = arith.constant 0 : i32
    %c0_i32_0 = arith.constant 0 : i32
    %c0_i32_1 = arith.constant 0 : i32
    return %c0_i32, %c0_i32_0 : i32, i32
  }
  func.func @transform_3(%arg0: i32) -> (i32, i32) {
    %c0_i32 = arith.constant 0 : i32
    %c0_i32_0 = arith.constant 0 : i32
    %c0_i32_1 = arith.constant 0 : i32
    return %c0_i32, %c0_i32_0 : i32, i32
  }
  func.func @transform_4(%arg0: i32) -> (i32, i32) {
    %c0_i32 = arith.constant 0 : i32
    %c0_i32_0 = arith.constant 0 : i32
    %c0_i32_1 = arith.constant 0 : i32
    return %c0_i32, %c0_i32_0 : i32, i32
  }
  func.func @transform_5(%arg0: i32) -> (i32, i32) {
    %c0_i32 = arith.constant 0 : i32
    %c0_i32_0 = arith.constant 0 : i32
    %c0_i32_1 = arith.constant 0 : i32
    return %c0_i32, %c0_i32_0 : i32, i32
  }
  func.func @transform_6(%arg0: i32) -> (i32, i32) {
    %c0_i32 = arith.constant 0 : i32
    %c0_i32_0 = arith.constant 0 : i32
    return %arg0, %c0_i32 : i32, i32
  }
}

</mosaic_0001>

<bundles_post_ra>
// kernel: tpu_custom_call.1
= control target key start
LH: loop header
LB: loop body
LE: loop exit
PB: predicated region body
PF: predicated region fallthrough
CT: control target
= control target key end

     0   :  { %11 = vsyncpa [#allocation3], 0  ;;  %s858_s0 = inlined_call_operand.hbm [shape: f32[8,128], index: 0, kind: input, shape index: {}]   ;;  %s859_s1 = inlined_call_operand.hbm [shape: bf16[128,128], index: 1, kind: input, shape index: {}]   ;;  %s860_s2 = inlined_call_operand.vmem [shape: f32[1,128], index: 2, kind: input, shape index: {}]   ;;  %s861_s3 = inlined_call_operand.hbm [shape: bf16[128,128], index: 3, kind: input, shape index: {}]   ;;  %s862_s4 = inlined_call_operand.hbm [shape: bf16[128,128], index: 4, kind: input, shape index: {}]   ;;  %s863_s5 = inlined_call_operand.vmem [shape: f32[1,128], index: 5, kind: input, shape index: {}]   ;;  %s864_s6 = inlined_call_operand.hbm [shape: f32[8,128], index: 6, kind: output, shape index: {}]  }
   0x1   :  { %12 = vsyncpa [#allocation6], 0 }
   0x2   :  { %13 = vsyncpa [#allocation9], 0 }
   0x3   :  { %14 = vsyncpa [#allocation4], 0  ;;  %s704_s21 = smov [#allocation5]   ;;  %s586_s25 = scalar_lea.hbm %s859_s1, 1024 }
   0x4   :  { %s30_s22 = sshll.u32 %s704_s21, 4  ;;  %p587_p0 = scmp.ne.s32.totalorder %s859_s1, %s586_s25  ;;  %s31_s22 = int_to_ptr.vmem [resolvable:$true] %s30_s22 }
   0x5   :  { %p590_p1 = scmp.lt.u32.totalorder %s586_s25, %s859_s1 }
   0x7   :  { %p592_p2 = pnand %p590_p1, %p587_p0 }
   0x9   :  { %595 = shalt.err (!%p592_p2)
}
   0xa   :  { %s596_s30 = scalar_lea.vmem %s31_s22, 1024  ;;  %p601_p4 = scmp.lt.s32.totalorder %s31_s22, %s31_s22 }
   0xb   :  { %p597_p3 = scmp.ne.s32.totalorder %s31_s22, %s596_s30  ;;  %p602_p5 = scmp.lt.s32.totalorder %s596_s30, %s596_s30 }
   0xd   :  { %p603_p6 = por %p602_p5, %p601_p4 }
   0xf   :  { %p604_p7 = pnand %p603_p6, %p597_p3 }
  0x11   :  { %607 = shalt.err (!%p604_p7)
}
  0x12   :  { %s705_s7 = smov 64   ;;  %s706_s8 = smov 4  }
  0x13   :  { %36 = dma.hbm_to_vmem [thread:$0]  %s859_s1, 1024, %s31_s22, [#allocation6], %s705_s7, %s705_s7, %s706_s8  }
  0x14   :  { %s707_s11 = smov [#allocation2]   ;;  %s708_s13 = smov [#allocation7]  }
  0x15   :  { %s21_s12 = sshll.u32 %s707_s11, 4  ;;  %s44_s14 = sshll.u32 %s708_s13, 4  ;;  %s22_s12 = int_to_ptr.vmem [resolvable:$true] %s21_s12  ;;  %s45_s14 = int_to_ptr.vmem [resolvable:$true] %s44_s14 }
  0x16   :  { %s608_s17 = scalar_lea.hbm %s858_s0, 128 }
  0x17   :  { %p609_p8 = scmp.ne.s32.totalorder %s858_s0, %s608_s17  ;;  %p612_p9 = scmp.lt.u32.totalorder %s608_s17, %s858_s0 }
  0x19   :  { %p614_p10 = pnand %p612_p9, %p609_p8 }
  0x1b   :  { %617 = shalt.err (!%p614_p10)
}
  0x1c   :  { %s618_s1 = scalar_lea.vmem %s22_s12, 128  ;;  %p623_p12 = scmp.lt.s32.totalorder %s22_s12, %s22_s12 }
  0x1d   :  { %p619_p11 = scmp.ne.s32.totalorder %s22_s12, %s618_s1  ;;  %p624_p13 = scmp.lt.s32.totalorder %s618_s1, %s618_s1 }
  0x1f   :  { %p625_p0 = por %p624_p13, %p623_p12 }
  0x21   :  { %p626_p1 = pnand %p625_p0, %p619_p11 }
  0x23   :  { %629 = shalt.err (!%p626_p1)
}
  0x24   :  { %24 = dma.hbm_to_vmem [thread:$0]  %s858_s0, 128, %s22_s12, [#allocation3]  }
  0x25   :  { %s630_s26 = scalar_lea.hbm %s861_s3, 1024 }
  0x26   :  { %p631_p2 = scmp.ne.s32.totalorder %s861_s3, %s630_s26  ;;  %p634_p3 = scmp.lt.u32.totalorder %s630_s26, %s861_s3 }
  0x28   :  { %p636_p4 = pnand %p634_p3, %p631_p2 }
  0x2a   :  { %639 = shalt.err (!%p636_p4)
}
  0x2b   :  { %s640_s9 = scalar_lea.vmem %s45_s14, 1024  ;;  %p645_p6 = scmp.lt.s32.totalorder %s45_s14, %s45_s14 }
  0x2c   :  { %p641_p5 = scmp.ne.s32.totalorder %s45_s14, %s640_s9  ;;  %p646_p7 = scmp.lt.s32.totalorder %s640_s9, %s640_s9 }
  0x2e   :  { %p647_p8 = por %p646_p7, %p645_p6 }
  0x30   :  { %p648_p9 = pnand %p647_p8, %p641_p5 }
  0x32   :  { %651 = shalt.err (!%p648_p9)
}
  0x33   :  { %50 = dma.hbm_to_vmem [thread:$0]  %s861_s3, 1024, %s45_s14, [#allocation6], %s705_s7, %s705_s7, %s706_s8  }
  0x34   :  { %s709_s11 = smov [#allocation8]   ;;  %s652_s16 = scalar_lea.hbm %s862_s4, 1024 }
  0x35   :  { %s56_s12 = sshll.u32 %s709_s11, 4  ;;  %p653_p10 = scmp.ne.s32.totalorder %s862_s4, %s652_s16  ;;  %s57_s12 = int_to_ptr.vmem [resolvable:$true] %s56_s12 }
  0x36   :  { %p656_p11 = scmp.lt.u32.totalorder %s652_s16, %s862_s4 }
  0x38   :  { %p658_p12 = pnand %p656_p11, %p653_p10 }
  0x3a   :  { %661 = shalt.err (!%p658_p12)
}
  0x3b   :  { %s662_s21 = scalar_lea.vmem %s57_s12, 1024  ;;  %p667_p0 = scmp.lt.s32.totalorder %s57_s12, %s57_s12 }
  0x3c   :  { %p663_p13 = scmp.ne.s32.totalorder %s57_s12, %s662_s21  ;;  %p668_p1 = scmp.lt.s32.totalorder %s662_s21, %s662_s21 }
  0x3e   :  { %p669_p2 = por %p668_p1, %p667_p0 }
  0x40   :  { %p670_p3 = pnand %p669_p2, %p663_p13 }
  0x42   :  { %673 = shalt.err (!%p670_p3)
}
  0x43   :  { %62 = dma.hbm_to_vmem [thread:$0]  %s862_s4, 1024, %s57_s12, [#allocation9], %s705_s7, %s705_s7, %s706_s8  }
  0x44   :  { %696 = dma.done.wait [#allocation3], 128  }
  0x45   :  { %697 = vsyncadd [#allocation3], 4294967168 }
  0x46   :  { %698 = dma.done.wait [#allocation6], 2048  }
  0x47   :  { %699 = vsyncadd [#allocation6], 4294965248 }
  0x48   :  { %700 = dma.done.wait [#allocation9], 1024  }
  0x49   :  { %701 = vsyncadd [#allocation9], 4294966272  ;;  %v710_v0 = vmov 0.0   ;;  %vm711_vm0 = vmmov 0   ;;  %v558_v1 = vld [vmem:[#allocation5] sm:$0xff]   ;;  %v559_v2 = vld [vmem:[#allocation5 + $0x8] sm:$0xff]  }
  0x4a   :  { %489 = vmatprep.subr.bf16.mxu0 %v710_v0  ;;  %505 = vmatprep.mubr.msk.bf16.mxu0 %vm711_vm0, %v710_v0  ;;  %v560_v3 = vld [vmem:[#allocation5 + $0x10] sm:$0xff]   ;;  %v566_v4 = vld [vmem:[#allocation7] sm:$0xff]   ;;  %v561_v5 = vld [vmem:[#allocation5 + $0x18] sm:$0xff]  }
  0x4b   :  { %509 = vmatprep.subr.bf16.mxu1 %v710_v0  ;;  %525 = vmatprep.mubr.msk.bf16.mxu1 %vm711_vm0, %v710_v0  ;;  %v567_v6 = vld [vmem:[#allocation7 + $0x8] sm:$0xff]   ;;  %v562_v7 = vld [vmem:[#allocation5 + $0x20] sm:$0xff]   ;;  %v568_v8 = vld [vmem:[#allocation7 + $0x10] sm:$0xff]  }
  0x4c   :  { %490 = vmatpush3.bf16.msra.mxu0 %v558_v1  ;;  %510 = vmatpush3.bf16.msra.mxu1 %v566_v4  ;;  %v563_v9 = vld [vmem:[#allocation5 + $0x28] sm:$0xff]   ;;  %v569_v10 = vld [vmem:[#allocation7 + $0x18] sm:$0xff]   ;;  %v564_v11 = vld [vmem:[#allocation5 + $0x30] sm:$0xff]  }
  0x4d   :  { %491 = vmatprep.subr.bf16.mxu0 %v710_v0  ;;  %511 = vmatprep.subr.bf16.mxu1 %v710_v0  ;;  %v570_v12 = vld [vmem:[#allocation7 + $0x20] sm:$0xff]   ;;  %v565_v13 = vld [vmem:[#allocation5 + $0x38] sm:$0xff]   ;;  %v571_v15 = vld [vmem:[#allocation7 + $0x28] sm:$0xff]  }
  0x4e   :  { %v821_v14 = vld [vmem:[#allocation2] sm:$0xff]  ;;  %v572_v17 = vld [vmem:[#allocation7 + $0x30] sm:$0xff]   ;;  %v574_v26 = vld [vmem:[#allocation8] sm:$0xff]  }
  0x4f   :  { %v79_v16 = vpack.c.bf16 %v821_v14, %v821_v14  ;;  %v573_v18 = vld [vmem:[#allocation7 + $0x38] sm:$0xff]   ;;  %v575_v27 = vld [vmem:[#allocation8 + $0x8] sm:$0xff]   ;;  %v576_v28 = vld [vmem:[#allocation8 + $0x10] sm:$0xff]  }
  0x50   :  { %492 = vmatpush3.bf16.msra.mxu0 %v559_v2  ;;  %512 = vmatpush3.bf16.msra.mxu1 %v567_v6  ;;  %v436_v19 = vld [vmem:[%s860_s2] ss:$0 sm:$0xff]  ;;  %v578_v36 = vld [vmem:[#allocation8 + $0x20] sm:$0xff]   ;;  %v579_v37 = vld [vmem:[#allocation8 + $0x28] sm:$0xff]  }
  0x51   :  { %493 = vmatprep.subr.bf16.mxu0 %v710_v0  ;;  %513 = vmatprep.subr.bf16.mxu1 %v710_v0  ;;  %v577_v29 = vld [vmem:[#allocation8 + $0x18] sm:$0xff]   ;;  %v580_v38 = vld [vmem:[#allocation8 + $0x30] sm:$0xff]  }
  0x52   :  { %v445_v30 = vld [vmem:[%s863_s5] ss:$0 sm:$0xff]  ;;  %s712_s5 = smov [#allocation10]  }
  0x53   :  { %v581_v39 = vld [vmem:[#allocation8 + $0x38] sm:$0xff]   ;;  %s425_s1 = sshll.u32 %s712_s5, 4  ;;  %s426_s1 = int_to_ptr.vmem [resolvable:$true] %s425_s1 }
  0x54   :  { %494 = vmatpush3.bf16.msra.mxu0 %v560_v3  ;;  %514 = vmatpush3.bf16.msra.mxu1 %v568_v8  ;;  %s674_s22 = scalar_lea.vmem %s426_s1, 128  ;;  %p679_p5 = scmp.lt.s32.totalorder %s426_s1, %s426_s1 }
  0x55   :  { %495 = vmatprep.subr.bf16.mxu0 %v710_v0  ;;  %515 = vmatprep.subr.bf16.mxu1 %v710_v0  ;;  %p675_p4 = scmp.ne.s32.totalorder %s426_s1, %s674_s22  ;;  %p680_p6 = scmp.lt.s32.totalorder %s674_s22, %s674_s22 }
  0x57   :  { %p681_p7 = por %p680_p6, %p679_p5 }
  0x58   :  { %496 = vmatpush3.bf16.msra.mxu0 %v561_v5  ;;  %516 = vmatpush3.bf16.msra.mxu1 %v569_v10 }
  0x59   :  { %497 = vmatprep.subr.bf16.mxu0 %v710_v0  ;;  %517 = vmatprep.subr.bf16.mxu1 %v710_v0  ;;  %p682_p8 = pnand %p681_p7, %p675_p4 }
  0x5c   :  { %498 = vmatpush3.bf16.msra.mxu0 %v562_v7  ;;  %518 = vmatpush3.bf16.msra.mxu1 %v570_v12 }
  0x5d   :  { %499 = vmatprep.subr.bf16.mxu0 %v710_v0  ;;  %519 = vmatprep.subr.bf16.mxu1 %v710_v0 }
  0x60   :  { %500 = vmatpush3.bf16.msra.mxu0 %v563_v9  ;;  %520 = vmatpush3.bf16.msra.mxu1 %v571_v15 }
  0x61   :  { %501 = vmatprep.subr.bf16.mxu0 %v710_v0  ;;  %521 = vmatprep.subr.bf16.mxu1 %v710_v0 }
  0x64   :  { %502 = vmatpush3.bf16.msra.mxu0 %v564_v11  ;;  %522 = vmatpush3.bf16.msra.mxu1 %v572_v17 }
  0x65   :  { %503 = vmatprep.subr.bf16.mxu0 %v710_v0  ;;  %523 = vmatprep.subr.bf16.mxu1 %v710_v0 }
  0x68   :  { %504 = vmatpush3.bf16.msra.mxu0 %v565_v13  ;;  %524 = vmatpush3.bf16.msra.mxu1 %v573_v18 }
  0x69   :  { %529 = vmatprep.subr.bf16.mxu0 %v710_v0 }
  0x6b   :  { %506 = vmatmul.mubr.bf16.vlgmr.msra.gmra.mrb[0].mxu0 %v79_v16 }
  0x6c   :  { %545 = vmatprep.mubr.msk.bf16.mxu0 %vm711_vm0, %v710_v0  ;;  %530 = vmatpush3.bf16.msra.mxu0 %v574_v26 }
  0x6d   :  { %531 = vmatprep.subr.bf16.mxu0 %v710_v0 }
  0x70   :  { %532 = vmatpush3.bf16.msra.mxu0 %v575_v27 }
  0x71   :  { %533 = vmatprep.subr.bf16.mxu0 %v710_v0 }
  0x74   :  { %534 = vmatpush3.bf16.msra.mxu0 %v576_v28 }
  0x75   :  { %535 = vmatprep.subr.bf16.mxu0 %v710_v0 }
  0x78   :  { %536 = vmatpush3.bf16.msra.mxu0 %v577_v29 }
  0x79   :  { %537 = vmatprep.subr.bf16.mxu0 %v710_v0 }
  0x7c   :  { %538 = vmatpush3.bf16.msra.mxu0 %v578_v36 }
  0x7d   :  { %539 = vmatprep.subr.bf16.mxu0 %v710_v0 }
  0x80   :  { %540 = vmatpush3.bf16.msra.mxu0 %v579_v37 }
  0x81   :  { %541 = vmatprep.subr.bf16.mxu0 %v710_v0 }
  0x84   :  { %542 = vmatpush3.bf16.msra.mxu0 %v580_v38 }
  0x85   :  { %543 = vmatprep.subr.bf16.mxu0 %v710_v0 }
  0x88   :  { %544 = vmatpush3.bf16.msra.mxu0 %v581_v39 }
 0x13e   :  { %v185_v20 = vpop.f32.mrb[0].mxu0 }
 0x13f   :  { %v186_v21 = vadd.f32 %v436_v19, %v185_v20  ;;  %v507_v22 = vpop.f32.mrb[1].mxu0 }
 0x140   :  { %v188_v23 = vpop.f32.mrb[2].mxu0 }
 0x141   :  { %v191_v24 = vpack.c.bf16 %v186_v21, %v186_v21  ;;  %v508_v25 = vpop.f32.mrb[3].mxu0 }
 0x143   :  { %526 = vmatmul.mubr.bf16.vlgmr.msra.gmra.mrb[0].mxu1 %v191_v24 }
 0x216   :  { %v297_v31 = vpop.f32.mrb[0].mxu1 }
 0x217   :  { %v298_v32 = vadd.f32 %v445_v30, %v297_v31  ;;  %v527_v33 = vpop.f32.mrb[1].mxu1 }
 0x218   :  { %v300_v34 = vpop.f32.mrb[2].mxu1 }
 0x219   :  { %303 = vmax.xlane.f32.xlu0 %v298_v32  ;;  %v528_v35 = vpop.f32.mrb[3].mxu1 }
 0x2a6   :  { %v304_v40 = vpop.xlane.xlu0 %303 }
 0x2a7   :  { %v305_v41 = vsub.f32 %v298_v32, %v304_v40 }
 0x2a9   :  { %v306_v42 = vmul.f32 1.442695, %v305_v41 }
 0x2ab   :  { %582 = vpow2.f32 %v306_v42 }
 0x2b5   :  { %v583_v43 = vpop.eup %582 }
 0x2b6   :  { %308 = vadd.xlane.f32.xlu0 %v583_v43  ;;  %v310_v44 = vpack.c.bf16 %v583_v43, %v583_v43 }
 0x2b8   :  { %546 = vmatmul.mubr.bf16.vlgmr.msra.gmra.mrb[4].mxu0 %v310_v44 }
 0x343   :  { %v309_v45 = vpop.xlane.xlu0 %308 }
 0x344   :  { %584 = vrcp.f32 %v309_v45 }
 0x34e   :  { %v585_v46 = vpop.eup %584 }
 0x38b   :  { %v409_v47 = vpop.f32.mrb[4].mxu0 }
 0x38c   :  { %v416_v48 = vmul.f32 %v585_v46, %v409_v47  ;;  %v547_v49 = vpop.f32.mrb[5].mxu0 }
 0x38d   :  { %v412_v50 = vpop.f32.mrb[6].mxu0 }
 0x38e   :  { %v417_v51 = vadd.f32 %v416_v48, %v821_v14  ;;  %v548_v52 = vpop.f32.mrb[7].mxu0 }
 0x390   :  { %418 = vst [vmem:[#allocation10] sm:$0xff] %v417_v51 }
 0x391   :  { %685 = shalt.err (!%p682_p8)
}
 0x392   :  { %s686_s25 = scalar_lea.hbm %s864_s6, 128 }
 0x393   :  { %p687_p9 = scmp.ne.s32.totalorder %s864_s6, %s686_s25  ;;  %p690_p10 = scmp.lt.u32.totalorder %s686_s25, %s864_s6 }
 0x395   :  { %p692_p11 = pnand %p690_p10, %p687_p9 }
 0x397   :  { %695 = shalt.err (!%p692_p11)
}
 0x398   :  { %428 = dma.vmem_to_hbm [thread:$0]  %s426_s1, 128, %s864_s6, [#allocation4]  }
 0x399   :  { %702 = dma.done.wait [#allocation4], 128  }
 0x39a   :  { %703 = vsyncadd [#allocation4], 4294967168 }
 0x39b   :  { %432 = vsyncpa [#allocation3], 1 }
 0x39c   :  { %433 = vsyncpa [#allocation6], 1 }
 0x39d   :  { %434 = vsyncpa [#allocation9], 1 }
 0x39e   :  { %435 = vsyncpa [#allocation4], 1 }

</bundles_post_ra>
